<compile_context>
chip_gen: v6e
topology: v6e:2x2x1
jax: 0.10.0
libtpu: 0.0.40
codegen_flags: <defaults>
</compile_context>

<pallas_src>
import jax
import jax.numpy as jnp
from jax import lax
from jax.experimental import pallas as pl
from jax.experimental.pallas import tpu as pltpu


# ----------------------------- kernels ----------------------------------------


def _conv_bn_relu(inp, w_ref, b_ref):
    # (rows, Cin) @ (Cin, Cout) on the MXU, f32 accumulation, fused bias + ReLU.
    acc = jnp.dot(inp, w_ref[...], preferred_element_type=jnp.float32)
    return jnp.maximum(acc + b_ref[...], 0.0)   # bias is already f32


def _proxy_kernel(compute_dtype):
    """grid=(B,): proxy slab (M, C_in) -> key (M, Kc), value (M, Kc)."""

    def kernel(proxy_ref,
               wo1_ref, bo1_ref, wo2_ref, bo2_ref, wd_ref, bd_ref,
               key_ref, val_ref):
        cdt = compute_dtype
        pxy = proxy_ref[0]                                   # (M, C_in)

        k = _conv_bn_relu(pxy, wo1_ref, bo1_ref)             # f_object, stage 1
        k = _conv_bn_relu(k.astype(cdt), wo2_ref, bo2_ref)   # f_object, stage 2
        v = _conv_bn_relu(pxy, wd_ref, bd_ref)               # f_down

        key_ref[0] = k.astype(key_ref.dtype)
        val_ref[0] = v.astype(val_ref.dtype)

    return kernel


def _pixel_attention_kernel(compute_dtype):
    """grid=(B, HW//THW): pixel tile (THW, C_in) + cached key/value -> out tile."""

    def kernel(x_ref, key_ref, val_ref,
               wp1_ref, bp1_ref, wp2_ref, bp2_ref, wu_ref, bu_ref,
               out_ref):
        cdt = compute_dtype
        x_t = x_ref[0]                                       # (THW, C_in)

        # f_pixel -> query tile (THW, Kc); Kc**-0.5 already folded into wp2/bp2.
        q = _conv_bn_relu(x_t, wp1_ref, bp1_ref)
        q = _conv_bn_relu(q.astype(cdt), wp2_ref, bp2_ref)

        k = key_ref[0]                                       # (M, Kc)
        v = val_ref[0]                                       # (M, Kc)

        # sim (THW, M) = q @ k^T  (contract over Kc), f32 accumulation.
        sim = lax.dot_general(
            q.astype(cdt), k,
            dimension_numbers=(((1,), (1,)), ((), ())),
            preferred_element_type=jnp.float32,
        )

        # Softmax over the small, fully-resident proxy axis M.
        m = jnp.max(sim, axis=-1, keepdims=True)
        e = jnp.exp(sim - m)
        l = jnp.sum(e, axis=-1, keepdims=True)
        sm = e * pl.reciprocal(l, approx=True)               # EUP slot, otherwise idle

        # context (THW, Kc) = sm @ value
        ctx = jnp.dot(sm.astype(cdt), v, preferred_element_type=jnp.float32)

        # f_up -> (THW, C_in), lane-dense output store.
        out = _conv_bn_relu(ctx.astype(cdt), wu_ref, bu_ref)
        out_ref[0] = out.astype(out_ref.dtype)

    return kernel


# ----------------------------- wrapper -----------------------------------------


def _fold_conv_bn(w, gamma, beta, mean, var, eps=1e-5, w_dtype=jnp.float32,
                  extra_scale=1.0):
    """Fold eval-mode BatchNorm into a bias-free 1x1 conv.

    w: (out, in).  Returns ((in, out) weight in `w_dtype`, (1, out) bias in f32).
    `extra_scale` (> 0) is an additional positive scale folded into both (commutes
    with the following ReLU).
    """
    s = gamma / jnp.sqrt(var + eps) * extra_scale
    w_eff = jnp.transpose(w * s[:, None])                    # (in, out)
    b_eff = ((beta - mean * gamma / jnp.sqrt(var + eps)) * extra_scale).reshape(1, -1)
    return w_eff.astype(w_dtype), b_eff.astype(jnp.float32)


def _full_spec(arr):
    zeros = (0,) * arr.ndim
    return pl.BlockSpec(arr.shape, lambda *args, _z=zeros: _z)


def object_attention_block(x, proxy, params, key_channels, scale=1,
                           block_hw=None, eps=1e-5):
    """x: (B, C_in, H, W), proxy: (B, C_in, Hp, Wp) -> (B, C_in, H, W)."""
    if scale > 1:
        # TODO(synk): scale>1 path (MaxPool2d downsample + bilinear align_corners=True
        # upsample) is resampling glue outside the attention kernel; not implemented.
        raise NotImplementedError("scale > 1 not supported in this Pallas port")

    B, C_in, H, W = x.shape
    _, _, Hp, Wp = proxy.shape
    HW, M = H * W, Hp * Wp
    dt = x.dtype
    Kc = key_channels
    inv_sqrt_kc = float(Kc) ** -0.5

    # Fold BN into the 1x1 convs: (in, out) weights in compute dtype, (1, out) f32 bias.
    wp1, bp1 = _fold_conv_bn(**params["pixel1"], eps=eps, w_dtype=dt)
    # Fold the attention scale Kc**-0.5 into the last f_pixel stage (positive scale,
    # commutes with ReLU) -> removes a per-tile VALU multiply on (THW, M).
    wp2, bp2 = _fold_conv_bn(**params["pixel2"], eps=eps, w_dtype=dt,
                             extra_scale=inv_sqrt_kc)
    wo1, bo1 = _fold_conv_bn(**params["object1"], eps=eps, w_dtype=dt)
    wo2, bo2 = _fold_conv_bn(**params["object2"], eps=eps, w_dtype=dt)
    wd, bd = _fold_conv_bn(**params["down"], eps=eps, w_dtype=dt)
    wu, bu = _fold_conv_bn(**params["up"], eps=eps, w_dtype=dt)

    # Channels-last, lane-dense layouts (C on the 128-lane axis).
    x_f = jnp.transpose(x, (0, 2, 3, 1)).reshape(B, HW, C_in)
    p_f = jnp.transpose(proxy, (0, 2, 3, 1)).reshape(B, M, C_in)

    # ---- pass 1: key / value from proxy (tiny, once per batch item) ----------
    proxy_weights = (wo1, bo1, wo2, bo2, wd, bd)
    key_v, val_v = pl.pallas_call(
        _proxy_kernel(dt),
        out_shape=(jax.ShapeDtypeStruct((B, M, Kc), dt),
                   jax.ShapeDtypeStruct((B, M, Kc), dt)),
        grid_spec=pltpu.PrefetchScalarGridSpec(
            num_scalar_prefetch=0,
            grid=(B,),
            in_specs=[pl.BlockSpec((1, M, C_in), lambda b: (b, 0, 0))]
                     + [_full_spec(w) for w in proxy_weights],
            out_specs=(pl.BlockSpec((1, M, Kc), lambda b: (b, 0, 0)),
                       pl.BlockSpec((1, M, Kc), lambda b: (b, 0, 0))),
        ),
        compiler_params=pltpu.CompilerParams(
            dimension_semantics=("parallel",),
        ),
    )(p_f, *proxy_weights)

    # ---- pass 2: tiled pixel attention ---------------------------------------
    # Pixel-axis tile: biggest candidate (multiple of 8) dividing HW.
    if block_hw is None:
        block_hw = HW
        for cand in (2048, 1024, 512, 256, 128, 64, 32, 16, 8):
            if HW % cand == 0:
                block_hw = cand
                break
    assert HW % block_hw == 0 and (block_hw % 8 == 0 or block_hw == HW)
    n_hw = HW // block_hw

    pixel_weights = (wp1, bp1, wp2, bp2, wu, bu)

    out = pl.pallas_call(
        _pixel_attention_kernel(dt),
        out_shape=jax.ShapeDtypeStruct((B, HW, C_in), dt),
        grid_spec=pltpu.PrefetchScalarGridSpec(
            num_scalar_prefetch=0,
            grid=(B, n_hw),
            in_specs=[
                pl.BlockSpec((1, block_hw, C_in), lambda b, j: (b, j, 0)),
                pl.BlockSpec((1, M, Kc), lambda b, j: (b, 0, 0)),
                pl.BlockSpec((1, M, Kc), lambda b, j: (b, 0, 0)),
            ] + [_full_spec(w) for w in pixel_weights],
            out_specs=pl.BlockSpec((1, block_hw, C_in), lambda b, j: (b, j, 0)),
        ),
        compiler_params=pltpu.CompilerParams(
            dimension_semantics=("parallel", "parallel"),
            vmem_limit_bytes=48 * 1024 * 1024,  # above defaults, below v7x 64 MiB
        ),
    )(x_f, key_v, val_v, *pixel_weights)

    # (B, HW, C) -> (B, C, H, W)  -- pure layout glue, done outside the kernel.
    return jnp.transpose(out.reshape(B, H, W, C_in), (0, 3, 1, 2))


# ------------------------- pure-JAX reference ----------------------------------


def _conv_bn_relu_ref(x, p, eps=1e-5):
    y = jnp.einsum("bchw,oc->bohw", x.astype(jnp.float32), p["w"].astype(jnp.float32))
    s = p["gamma"] / jnp.sqrt(p["var"] + eps)
    y = (y - p["mean"][None, :, None, None]) * s[None, :, None, None] \
        + p["beta"][None, :, None, None]
    return jnp.maximum(y, 0.0)


def object_attention_ref(x, proxy, params, key_channels, eps=1e-5):
    B, C, H, W = x.shape
    Kc = key_channels
    q = _conv_bn_relu_ref(_conv_bn_relu_ref(x, params["pixel1"], eps), params["pixel2"], eps)
    k = _conv_bn_relu_ref(_conv_bn_relu_ref(proxy, params["object1"], eps), params["object2"], eps)
    v = _conv_bn_relu_ref(proxy, params["down"], eps)
    query = q.reshape(B, Kc, -1).transpose(0, 2, 1)       # (B, HW, Kc)
    key = k.reshape(B, Kc, -1)                            # (B, Kc, M)
    value = v.reshape(B, Kc, -1).transpose(0, 2, 1)       # (B, M, Kc)
    sim = jnp.matmul(query, key) * (Kc ** -0.5)
    sim = jax.nn.softmax(sim, axis=-1)
    ctx = jnp.matmul(sim, value)                          # (B, HW, Kc)
    ctx = ctx.transpose(0, 2, 1).reshape(B, Kc, H, W)
    return _conv_bn_relu_ref(ctx, params["up"], eps)


def _make_conv_bn(key, cin, cout):
    kw, kg, kb, km, kv = jax.random.split(key, 5)
    return dict(
        w=jax.random.normal(kw, (cout, cin), jnp.float32) / jnp.sqrt(float(cin)),
        gamma=1.0 + 0.1 * jax.random.normal(kg, (cout,), jnp.float32),
        beta=0.1 * jax.random.normal(kb, (cout,), jnp.float32),
        mean=0.1 * jax.random.normal(km, (cout,), jnp.float32),
        var=1.0 + 0.2 * jax.random.uniform(kv, (cout,), jnp.float32),
    )


if __name__ == "__main__":
    key = jax.random.PRNGKey(0)
    B, C_in, Kc, H, W = 2, 32, 16, 16, 16   # in_channels=32, key_channels=16, 16x16 pixels
    Hp, Wp = 8, 1                           # proxy: 8 object regions (HRNet-OCR style)

    keys = jax.random.split(key, 8)
    x = jax.random.normal(keys[0], (B, C_in, H, W), dtype=jnp.float32)
    proxy = jax.random.normal(keys[1], (B, C_in, Hp, Wp), dtype=jnp.float32)

    params = {
        "pixel1": _make_conv_bn(keys[2], C_in, Kc),
        "pixel2": _make_conv_bn(keys[3], Kc, Kc),
        "object1": _make_conv_bn(keys[4], C_in, Kc),
        "object2": _make_conv_bn(keys[5], Kc, Kc),
        "down": _make_conv_bn(keys[6], C_in, Kc),
        "up": _make_conv_bn(keys[7], Kc, C_in),
    }

    out = object_attention_block(x, proxy, params, key_channels=Kc, scale=1, block_hw=64)
    out = jax.block_until_ready(out)

    ref = object_attention_ref(x, proxy, params, key_channels=Kc)
    assert out.shape == (B, C_in, H, W), out.shape
    max_err = float(jnp.max(jnp.abs(out - ref)))
    assert jnp.allclose(out, ref, atol=2e-2, rtol=2e-2), max_err

    print("KERNEL_OK")
</pallas_src>

<mosaic_0001>
module attributes {stable_mosaic.version = 11 : i64} {
  func.func @kernel(%arg0: i32, %arg1: memref<1x8x32xf32, #tpu.memory_space<vmem>>, %arg2: memref<32x16xf32, #tpu.memory_space<vmem>>, %arg3: memref<1x16xf32, #tpu.memory_space<vmem>>, %arg4: memref<16x16xf32, #tpu.memory_space<vmem>>, %arg5: memref<1x16xf32, #tpu.memory_space<vmem>>, %arg6: memref<32x16xf32, #tpu.memory_space<vmem>>, %arg7: memref<1x16xf32, #tpu.memory_space<vmem>>, %arg8: memref<1x8x16xf32, #tpu.memory_space<vmem>>, %arg9: memref<1x8x16xf32, #tpu.memory_space<vmem>>) attributes {dimension_semantics = [#tpu.dimension_semantics<parallel>], iteration_bounds = array<i64: 2>, scalar_prefetch = 0 : i64, scratch_operands = 0 : i64, tpu.core_type = #tpu.core_type<tc>, window_params = [{transform_indices = @transform_0, window_bounds = array<i64: 1, 8, 32>}, {pipeline_mode = #tpu.pipeline_mode<synchronous>, transform_indices = @transform_1, window_bounds = array<i64: 32, 16>}, {pipeline_mode = #tpu.pipeline_mode<synchronous>, transform_indices = @transform_2, window_bounds = array<i64: 1, 16>}, {pipeline_mode = #tpu.pipeline_mode<synchronous>, transform_indices = @transform_3, window_bounds = array<i64: 16, 16>}, {pipeline_mode = #tpu.pipeline_mode<synchronous>, transform_indices = @transform_4, window_bounds = array<i64: 1, 16>}, {pipeline_mode = #tpu.pipeline_mode<synchronous>, transform_indices = @transform_5, window_bounds = array<i64: 32, 16>}, {pipeline_mode = #tpu.pipeline_mode<synchronous>, transform_indices = @transform_6, window_bounds = array<i64: 1, 16>}, {transform_indices = @transform_7, window_bounds = array<i64: 1, 8, 16>}, {transform_indices = @transform_8, window_bounds = array<i64: 1, 8, 16>}]} {
    %c0 = arith.constant 0 : index
    %c0_0 = arith.constant 0 : index
    %c0_1 = arith.constant 0 : index
    %0 = vector.load %arg1[%c0, %c0_0, %c0_1] : memref<1x8x32xf32, #tpu.memory_space<vmem>>, vector<1x8x32xf32>
    %1 = vector.shape_cast %0 : vector<1x8x32xf32> to vector<8x32xf32>
    %c0_2 = arith.constant 0 : index
    %c0_3 = arith.constant 0 : index
    %2 = vector.load %arg2[%c0_2, %c0_3] : memref<32x16xf32, #tpu.memory_space<vmem>>, vector<32x16xf32>
    %cst = arith.constant dense<0.000000e+00> : vector<8x16xf32>
    %3 = tpu.matmul %1, %2, %cst {dimension_numbers = #tpu.dot_dimension_numbers<[1], [0], [0], [1], [0, 0, 1, 1], [], []>} : vector<8x32xf32>, vector<32x16xf32>, vector<8x16xf32> -> vector<8x16xf32>
    %c0_4 = arith.constant 0 : index
    %c0_5 = arith.constant 0 : index
    %4 = vector.load %arg3[%c0_4, %c0_5] : memref<1x16xf32, #tpu.memory_space<vmem>>, vector<1x16xf32>
    %5 = vector.broadcast %4 : vector<1x16xf32> to vector<8x16xf32>
    %6 = arith.addf %3, %5 : vector<8x16xf32>
    %cst_6 = arith.constant 0.000000e+00 : f32
    %7 = vector.broadcast %cst_6 : f32 to vector<8x16xf32>
    %8 = arith.maximumf %6, %7 : vector<8x16xf32>
    %c0_7 = arith.constant 0 : index
    %c0_8 = arith.constant 0 : index
    %9 = vector.load %arg4[%c0_7, %c0_8] : memref<16x16xf32, #tpu.memory_space<vmem>>, vector<16x16xf32>
    %cst_9 = arith.constant dense<0.000000e+00> : vector<8x16xf32>
    %10 = tpu.matmul %8, %9, %cst_9 {dimension_numbers = #tpu.dot_dimension_numbers<[1], [0], [0], [1], [0, 0, 1, 1], [], []>} : vector<8x16xf32>, vector<16x16xf32>, vector<8x16xf32> -> vector<8x16xf32>
    %c0_10 = arith.constant 0 : index
    %c0_11 = arith.constant 0 : index
    %11 = vector.load %arg5[%c0_10, %c0_11] : memref<1x16xf32, #tpu.memory_space<vmem>>, vector<1x16xf32>
    %12 = vector.broadcast %11 : vector<1x16xf32> to vector<8x16xf32>
    %13 = arith.addf %10, %12 : vector<8x16xf32>
    %cst_12 = arith.constant 0.000000e+00 : f32
    %14 = vector.broadcast %cst_12 : f32 to vector<8x16xf32>
    %15 = arith.maximumf %13, %14 : vector<8x16xf32>
    %c0_13 = arith.constant 0 : index
    %c0_14 = arith.constant 0 : index
    %16 = vector.load %arg6[%c0_13, %c0_14] : memref<32x16xf32, #tpu.memory_space<vmem>>, vector<32x16xf32>
    %cst_15 = arith.constant dense<0.000000e+00> : vector<8x16xf32>
    %17 = tpu.matmul %1, %16, %cst_15 {dimension_numbers = #tpu.dot_dimension_numbers<[1], [0], [0], [1], [0, 0, 1, 1], [], []>} : vector<8x32xf32>, vector<32x16xf32>, vector<8x16xf32> -> vector<8x16xf32>
    %c0_16 = arith.constant 0 : index
    %c0_17 = arith.constant 0 : index
    %18 = vector.load %arg7[%c0_16, %c0_17] : memref<1x16xf32, #tpu.memory_space<vmem>>, vector<1x16xf32>
    %19 = vector.broadcast %18 : vector<1x16xf32> to vector<8x16xf32>
    %20 = arith.addf %17, %19 : vector<8x16xf32>
    %cst_18 = arith.constant 0.000000e+00 : f32
    %21 = vector.broadcast %cst_18 : f32 to vector<8x16xf32>
    %22 = arith.maximumf %20, %21 : vector<8x16xf32>
    %c0_19 = arith.constant 0 : index
    %c0_20 = arith.constant 0 : index
    %c0_21 = arith.constant 0 : index
    %23 = vector.load %arg8[%c0_19, %c0_20, %c0_21] : memref<1x8x16xf32, #tpu.memory_space<vmem>>, vector<1x8x16xf32>
    %24 = vector.shape_cast %23 : vector<1x8x16xf32> to vector<8x16xf32>
    %25 = vector.shape_cast %15 : vector<8x16xf32> to vector<1x8x16xf32>
    tpu.vector_store %arg8[%c0_19, %c0_20, %c0_21], %25 {strides = array<i32>} : memref<1x8x16xf32, #tpu.memory_space<vmem>>, vector<1x8x16xf32>,
    %c0_22 = arith.constant 0 : index
    %c0_23 = arith.constant 0 : index
    %c0_24 = arith.constant 0 : index
    %26 = vector.load %arg9[%c0_22, %c0_23, %c0_24] : memref<1x8x16xf32, #tpu.memory_space<vmem>>, vector<1x8x16xf32>
    %27 = vector.shape_cast %26 : vector<1x8x16xf32> to vector<8x16xf32>
    %28 = vector.shape_cast %22 : vector<8x16xf32> to vector<1x8x16xf32>
    tpu.vector_store %arg9[%c0_22, %c0_23, %c0_24], %28 {strides = array<i32>} : memref<1x8x16xf32, #tpu.memory_space<vmem>>, vector<1x8x16xf32>,
    return
  }
  func.func @transform_0(%arg0: i32) -> (i32, i32, i32) {
    %c0_i32 = arith.constant 0 : i32
    %c0_i32_0 = arith.constant 0 : i32
    %c0_i32_1 = arith.constant 0 : i32
    return %arg0, %c0_i32, %c0_i32_0 : i32, i32, i32
  }
  func.func @transform_1(%arg0: i32) -> (i32, i32) {
    %c0_i32 = arith.constant 0 : i32
    %c0_i32_0 = arith.constant 0 : i32
    %c0_i32_1 = arith.constant 0 : i32
    return %c0_i32, %c0_i32_0 : i32, i32
  }
  func.func @transform_2(%arg0: i32) -> (i32, i32) {
    %c0_i32 = arith.constant 0 : i32
    %c0_i32_0 = arith.constant 0 : i32
    %c0_i32_1 = arith.constant 0 : i32
    return %c0_i32, %c0_i32_0 : i32, i32
  }
  func.func @transform_3(%arg0: i32) -> (i32, i32) {
    %c0_i32 = arith.constant 0 : i32
    %c0_i32_0 = arith.constant 0 : i32
    %c0_i32_1 = arith.constant 0 : i32
    return %c0_i32, %c0_i32_0 : i32, i32
  }
  func.func @transform_4(%arg0: i32) -> (i32, i32) {
    %c0_i32 = arith.constant 0 : i32
    %c0_i32_0 = arith.constant 0 : i32
    %c0_i32_1 = arith.constant 0 : i32
    return %c0_i32, %c0_i32_0 : i32, i32
  }
  func.func @transform_5(%arg0: i32) -> (i32, i32) {
    %c0_i32 = arith.constant 0 : i32
    %c0_i32_0 = arith.constant 0 : i32
    %c0_i32_1 = arith.constant 0 : i32
    return %c0_i32, %c0_i32_0 : i32, i32
  }
  func.func @transform_6(%arg0: i32) -> (i32, i32) {
    %c0_i32 = arith.constant 0 : i32
    %c0_i32_0 = arith.constant 0 : i32
    %c0_i32_1 = arith.constant 0 : i32
    return %c0_i32, %c0_i32_0 : i32, i32
  }
  func.func @transform_7(%arg0: i32) -> (i32, i32, i32) {
    %c0_i32 = arith.constant 0 : i32
    %c0_i32_0 = arith.constant 0 : i32
    %c0_i32_1 = arith.constant 0 : i32
    return %arg0, %c0_i32, %c0_i32_0 : i32, i32, i32
  }
  func.func @transform_8(%arg0: i32) -> (i32, i32, i32) {
    %c0_i32 = arith.constant 0 : i32
    %c0_i32_0 = arith.constant 0 : i32
    %c0_i32_1 = arith.constant 0 : i32
    return %arg0, %c0_i32, %c0_i32_0 : i32, i32, i32
  }
}

</mosaic_0001>

<bundles_post_ra>
// kernel: tpu_custom_call.1
= control target key start
LH: loop header
LB: loop body
LE: loop exit
PB: predicated region body
PF: predicated region fallthrough
CT: control target
= control target key end

     0   :  { %s1106_s0 = inlined_call_operand.vmem [shape: f32[2,8,32], index: 0, kind: input, shape index: {}]   ;;  %s1107_s1 = inlined_call_operand.vmem [shape: f32[32,16], index: 1, kind: input, shape index: {}]   ;;  %s1108_s2 = inlined_call_operand.vmem [shape: f32[1,16], index: 2, kind: input, shape index: {}]   ;;  %s1109_s3 = inlined_call_operand.vmem [shape: f32[16,16], index: 3, kind: input, shape index: {}]   ;;  %s1110_s4 = inlined_call_operand.vmem [shape: f32[1,16], index: 4, kind: input, shape index: {}]   ;;  %s1111_s5 = inlined_call_operand.vmem [shape: f32[32,16], index: 5, kind: input, shape index: {}]   ;;  %s1112_s6 = inlined_call_operand.vmem [shape: f32[1,16], index: 6, kind: input, shape index: {}]   ;;  %s1113_s7 = inlined_call_operand.hbm [shape: f32[2,8,16], index: 7, kind: output, shape index: {0}]   ;;  %s1114_s8 = inlined_call_operand.hbm [shape: f32[2,8,16], index: 8, kind: output, shape index: {1}]  }
   0x1   :  { %1116 = sst [smem:[#allocation8_spill]] %s1106_s0 }
   0x2   :  { %14 = vsyncpa [#allocation3], 0 }
   0x3   :  { %16 = vsyncpa [#allocation3 + $0x1], 0 }
   0x4   :  { %17 = vsyncpa [#allocation5], 0 }
   0x5   :  { %19 = vsyncpa [#allocation5 + $0x1], 0  ;;  %s938_s27 = smov 0   ;;  %s940_s28 = smov 0  }
   0x6   :  { %s942_s29 = smov 0   ;;  %s944_s30 = smov 0  }
   0x7 LB: > { %s959_s9 = sadd.s32 4294967295, %s887_s30   ;;  %s690_s10 = sadd.s32 4294967294, %s887_s30   ;;  %s887_s30 = sphi %s944_s30, %s1124_s30   ;;  %s883_s29 = sphi %s942_s29, %s1123_s29   ;;  %s879_s28 = sphi %s940_s28, %s1122_s28   ;;  %s875_s27 = sphi %s938_s27, %s1121_s27  }
   0x8   : > { %s963_s11 = sadd.s32 1, %s887_s30   ;;  %s184_s12 = sadd.s32 1, %s883_s29 }
   0x9   : > { %s181_s13 = ssub.s32 %s887_s30, %s963_s11  ;;  %p194_p0 = scmp.ne.s32.totalorder %s883_s29, %s879_s28 }
   0xa   : > { %p182_p1 = scmp.eq.s32.totalorder %s181_s13, 0  ;;  %p195_p2 = scmp.eq.s32.totalorder %s959_s9, 1 }
   0xb   : > { %p200_p3 = scmp.ne.s32.totalorder %s879_s28, %s875_s27  ;;  %p201_p4 = scmp.eq.s32.totalorder %s690_s10, 1 }
   0xc   : > { %s974_s14 = scalar_select %p182_p1, %s883_s29, %s184_s12  }
   0xd   : > { %p976_p5 = por %p195_p2, %p194_p0  ;;  %p980_p6 = por %p201_p4, %p200_p3 }
   0xe   : > { %p693_p7 = scmp.ge.s32.totalorder %s887_s30, 1  ;;  %p270_p8 = scmp.lt.s32.totalorder %s887_s30, 3 }
  0x10   : > { %p271_p9 = pnand %p693_p7, %p270_p8 }
  0x11   : > { %p308_p10 = scmp.lt.s32.totalorder (!%p271_p9), %s959_s9, 1  ;;  %s1119_s0 = sld [smem:[#allocation8_spill]] (!%p271_p9) }
  0x12   : > { %274 = sbr.rel (%p271_p9) target bundleno = 463 (0x1cf), region = 48  ;;  %s1031_s18 = sand.u32 (!%p271_p9), 1, %s879_s28  }
  0x13   : > { %s1115_s19 = sshll.u32 (!%p271_p9), %s1031_s18, 3  ;;  %s705_s22 = sshll.u32 (!%p271_p9), %s959_s9, 7 }
  0x14   : > { %s300_s23 = scalar_lea.vmem (!%p271_p9), [#allocation2], %s1115_s19  ;;  %s1045_s10 = scalar_lea.hbm (!%p271_p9), %s1113_s7, %s705_s22 }
  0x15   : > { %s568_s17 = scalar_lea.sflag (!%p271_p9), [#allocation3], %s1031_s18 }
  0x17   : > { %v316_v0 = vld [vmem:[%s1107_s1 + $0x18] sm:$0xff]  ;;  %v889_v1 = vmov 0.0   ;;  %v315_v2 = vld [vmem:[%s1107_s1 + $0x10] sm:$0xff]  ;;  %vm890_vm0 = vmmov 0   ;;  %s309_s21 = scalar_select %p308_p10, %s959_s9, 1  ;;  %v314_v3 = vld [vmem:[%s1107_s1 + $0x8] sm:$0xff] }
  0x18   : > { %722 = vmatprep.subr.mxu0 %v889_v1  ;;  %730 = vmatprep.mubr.msk.f32.mxu0 %vm890_vm0, %v889_v1  ;;  %v313_v4 = vld [vmem:[%s1107_s1] sm:$0xff]  ;;  %vm324_vm1 = vcmask 261120   ;;  %v400_v6 = vld [vmem:[%s1109_s3 + $0x8] sm:$0xff]  ;;  %vm408_vm2 = vcmask 130048   ;;  %v486_v13 = vld [vmem:[%s1111_s5 + $0x18] sm:$0xff] }
  0x19   : > { %723 = vmatpush3.msra.mxu0 %v316_v0  ;;  %733 = vmatprep.subr.mxu1 %v889_v1  ;;  %s696_s24 = sshll.u32 %s309_s21, 3  ;;  %v399_v7 = vld [vmem:[%s1109_s3] sm:$0xff]  ;;  %v485_v14 = vld [vmem:[%s1111_s5 + $0x10] sm:$0xff]  ;;  %v484_v15 = vld [vmem:[%s1111_s5 + $0x8] sm:$0xff]  ;;  %s891_s21 = smov [#allocation2]  }
  0x1a   : > { %724 = vmatprep.subr.mxu0 %v889_v1  ;;  %737 = vmatprep.mubr.msk.f32.mxu1 %vm890_vm0, %v889_v1  ;;  %s311_s13 = scalar_lea.vmem %s1119_s0, %s696_s24  ;;  %v697_v8 = vld [vmem:[%s1108_s2] ss:$0 sm:$0xff]  ;;  %s586_s24 = sshll.u32 %s300_s23, 4  ;;  %s587_s24 = int_to_ptr.vmem [resolvable:$true] %s586_s24 }
  0x1b   : > { %725 = vmatpush3.msra.mxu0 %v315_v2  ;;  %v312_v5 = vld [vmem:[%s311_s13] sm:$0xff]  ;;  %734 = vmatpush3.msra.mxu1 %v400_v6  ;;  %s797_s20 = scalar_lea.vmem %s587_s24, 128  ;;  %s801_s19 = sshll.u32 %s891_s21, 4  ;;  %s802_s19 = int_to_ptr.vmem [resolvable:$false] %s801_s19 }
  0x1c   : > { %726 = vmatprep.subr.mxu0 %v889_v1  ;;  %735 = vmatprep.subr.mxu1 %v889_v1  ;;  %v483_v16 = vld [vmem:[%s1111_s5] sm:$0xff]  ;;  %p798_p11 = scmp.ne.s32.totalorder %s587_s24, %s797_s20  ;;  %s803_s0 = scalar_lea.vmem %s802_s19, 256 }
  0x1d   : > { %727 = vmatpush3.msra.mxu0 %v314_v3  ;;  %736 = vmatpush3.msra.mxu1 %v399_v7  ;;  %v699_v17 = vld [vmem:[%s1110_s4] ss:$0 sm:$0xff]  ;;  %p804_p0 = scmp.lt.s32.totalorder %s587_s24, %s802_s19  ;;  %p805_p1 = scmp.lt.s32.totalorder %s803_s0, %s797_s20 }
  0x1e   : > { %728 = vmatprep.subr.mxu0 %v889_v1  ;;  %740 = vmatprep.subr.mxu1 %v889_v1  ;;  %v701_v22 = vld [vmem:[%s1112_s6] ss:$0 sm:$0xff]  ;;  %p799_p12 = pnand %p798_p11, %p976_p5 }
  0x1f   : > { %729 = vmatpush3.msra.mxu0 %v313_v4  ;;  %p806_p2 = por %p805_p1, %p804_p0 }
  0x20   : > { %731 = vmatmul.mubr.msk.f32.vlgmr.msra.gmra.mxu0 %vm324_vm1, %v312_v5  ;;  %p800_p13 = pneg %p799_p12 }
  0x22   : > { %p807_p3 = pnand %p806_p2, %p800_p13 }
  0xe0   : > { %v394_v9 = vpop.f32.mrf.mxu0 }
  0xe1   : > { %v395_v10 = vadd.f32 %v697_v8, %v394_v9 }
  0xe2   : > { %v732_v11 = vpop.f32.mrf.mxu0 }
  0xe3   : > { %v398_v12 = vmax.f32 %v395_v10, 0.0 }
  0xe5   : > { %738 = vmatmul.mubr.msk.f32.vlgmr.msra.gmra.mxu1 %vm408_vm2, %v398_v12 }
  0xe6   : > { %741 = vmatpush3.msra.mxu1 %v486_v13  ;;  %748 = vmatprep.mubr.msk.f32.mxu1 %vm890_vm0, %v889_v1 }
  0xe7   : > { %742 = vmatprep.subr.mxu1 %v889_v1 }
  0xe8   : > { %743 = vmatpush3.msra.mxu1 %v485_v14 }
  0xe9   : > { %744 = vmatprep.subr.mxu1 %v889_v1 }
  0xea   : > { %745 = vmatpush3.msra.mxu1 %v484_v15 }
  0xeb   : > { %746 = vmatprep.subr.mxu1 %v889_v1 }
  0xec   : > { %747 = vmatpush3.msra.mxu1 %v483_v16 }
  0xed   : > { %749 = vmatmul.mubr.msk.f32.vlgmr.msra.gmra.mxu1 %vm324_vm1, %v312_v5 }
 0x1a5   : > { %v478_v18 = vpop.f32.mrf.mxu1 }
 0x1a6   : > { %v479_v19 = vadd.f32 %v699_v17, %v478_v18 }
 0x1a7   : > { %v739_v20 = vpop.f32.mrf.mxu1 }
 0x1a8   : > { %v482_v21 = vmax.f32 %v479_v19, 0.0 }
 0x1aa   : > { %565 = vst.msk [vmem:[%s300_s23] sm:$0xff] %vm408_vm2, %v482_v21 }
 0x1ab   : > { %810 = shalt.err (!%p807_p3)
}
 0x1ac   : > { %s811_s23 = scalar_lea.hbm %s1045_s10, 128  ;;  %s815_s12 = scalar_lea.hbm %s1113_s7, 256 }
 0x1ad   : > { %p812_p4 = scmp.ne.s32.totalorder %s1045_s10, %s811_s23  ;;  %p816_p9 = scmp.lt.s32.totalorder %s1045_s10, %s1113_s7 }
 0x1ae   : > { %p817_p10 = scmp.lt.s32.totalorder %s815_s12, %s811_s23 }
 0x1af   : > { %p813_p7 = pnand %p812_p4, %p976_p5 }
 0x1b0   : > { %p818_p11 = por %p817_p10, %p816_p9 }
 0x1b1   : > { %p814_p8 = pneg %p813_p7 }
 0x1b3   : > { %p819_p12 = pnand %p818_p11, %p814_p8 }
 0x1b5   : > { %822 = shalt.err (!%p819_p12)
}
 0x1b6   : > { %751 = dma.vmem_to_hbm [thread:$0]  (%p976_p5), %s587_s24, 128, %s1045_s10, %s568_s17   ;;  %v560_v23 = vpop.f32.mrf.mxu1 }
 0x1b7   : > { %s1120_s0 = sshll.u32 %s1031_s18, 3  ;;  %v561_v24 = vadd.f32 %v701_v22, %v560_v23  ;;  %s597_s26 = scalar_lea.hbm %s1114_s8, %s705_s22 }
 0x1b8   : > { %s307_s19 = scalar_lea.vmem [#allocation4], %s1120_s0  ;;  %v750_v25 = vpop.f32.mrf.mxu1  ;;  %s573_s12 = scalar_lea.sflag [#allocation5], %s1031_s18 }
 0x1b9   : > { %s599_s20 = sshll.u32 %s307_s19, 4  ;;  %v564_v26 = vmax.f32 %v561_v24, 0.0  ;;  %s892_s24 = smov [#allocation4]   ;;  %s600_s20 = int_to_ptr.vmem [resolvable:$true] %s599_s20 }
 0x1ba   : > { %s823_s13 = scalar_lea.vmem %s600_s20, 128  ;;  %s827_s10 = sshll.u32 %s892_s24, 4  ;;  %s828_s10 = int_to_ptr.vmem [resolvable:$false] %s827_s10 }
 0x1bb   : > { %566 = vst.msk [vmem:[%s307_s19] sm:$0xff] %vm408_vm2, %v564_v26  ;;  %p824_p13 = scmp.ne.s32.totalorder %s600_s20, %s823_s13  ;;  %s829_s17 = scalar_lea.vmem %s828_s10, 256 }
 0x1bc   : > { %p830_p2 = scmp.lt.s32.totalorder %s600_s20, %s828_s10  ;;  %p831_p3 = scmp.lt.s32.totalorder %s829_s17, %s823_s13 }
 0x1bd   : > { %p825_p0 = pnand %p824_p13, %p976_p5 }
 0x1be   : > { %p832_p4 = por %p831_p3, %p830_p2 }
 0x1bf   : > { %p826_p1 = pneg %p825_p0 }
 0x1c1   : > { %p833_p7 = pnand %p832_p4, %p826_p1 }
 0x1c3   : > { %836 = shalt.err (!%p833_p7)
}
 0x1c4   : > { %s837_s9 = scalar_lea.hbm %s597_s26, 128  ;;  %s841_s21 = scalar_lea.hbm %s1114_s8, 256 }
 0x1c5   : > { %p838_p8 = scmp.ne.s32.totalorder %s597_s26, %s837_s9  ;;  %p842_p11 = scmp.lt.s32.totalorder %s597_s26, %s1114_s8 }
 0x1c6   : > { %p843_p12 = scmp.lt.s32.totalorder %s841_s21, %s837_s9 }
 0x1c7   : > { %p839_p9 = pnand %p838_p8, %p976_p5 }
 0x1c8   : > { %p844_p13 = por %p843_p12, %p842_p11 }
 0x1c9   : > { %p840_p10 = pneg %p839_p9 }
 0x1cb   : > { %p845_p0 = pnand %p844_p13, %p840_p10 }
 0x1cd   : > { %848 = shalt.err (!%p845_p0)
}
 0x1ce   : > { %752 = dma.vmem_to_hbm [thread:$0]  (%p976_p5), %s600_s20, 128, %s597_s26, %s573_s12  }
 0x1cf PF: > { %p762_p1 = scmp.ge.s32.totalorder %s887_s30, 2  ;;  %s611_s23 = sand.u32 1, %s875_s27  }
 0x1d0   : > { %s612_s25 = scalar_lea.sflag [#allocation3], %s611_s23 }
 0x1d1   : > { %p756_p2 = pnand %p762_p1, %p980_p6 }
 0x1d3   : > { %p757_p3 = pneg %p756_p2 }
 0x1d5   : > { %866 = dma.done.wait (%p757_p3), %s612_s25, 128  }
 0x1d6   : > { %868 = vsyncadd (%p757_p3), %s612_s25, 4294967168  ;;  %s621_s13 = scalar_lea.sflag [#allocation5], %s611_s23 }
 0x1d7   : > { %870 = dma.done.wait (%p757_p3), %s621_s13, 128  }
 0x1d8   : > { %872 = vsyncadd (%p757_p3), %s621_s13, 4294967168  ;;  %p22_p5 = scmp.ge.s32.totalorder %s963_s11, 4   ;;  %s1121_s27 = smov %s879_s28 }
 0x1d9   : > { %s1122_s28 = smov %s883_s29  ;;  %s1123_s29 = smov %s974_s14 }
 0x1da   : > { %s1124_s30 = smov %s963_s11  ;;  %24 = sbr.rel (!%p22_p5) target bundleno = 7 (0x7), region = 100 }
 0x1df   :  { %626 = vsyncpa [#allocation3], 1 }
 0x1e0   :  { %628 = vsyncpa [#allocation3 + $0x1], 1 }
 0x1e1   :  { %629 = vsyncpa [#allocation5], 1 }
 0x1e2   :  { %631 = vsyncpa [#allocation5 + $0x1], 1 }

</bundles_post_ra>
